<compile_context>
chip_gen: v6e
topology: v6e:2x2x1
jax: 0.10.0
libtpu: 0.0.40
codegen_flags: <defaults>
</compile_context>

<pallas_src>
import functools

import jax
import jax.numpy as jnp
from jax.experimental import pallas as pl
from jax.experimental.pallas import tpu as pltpu

_LANES = 128


def _ce_loss_kernel(logits_ref, tar_ref, out_ref, *, num_classes):
    # logits_ref: (1, C, TILE_ROWS, 128) in native dtype (cast in-register is
    # free VPU work under the HBM bound). tar_ref: (1, 1, TILE_ROWS, 128) int32.
    tar = tar_ref[0, 0]                                   # (R, 128) int32
    valid = tar >= 0                                      # masks ignore_index AND all padding

    if num_classes == 2:
        # Binary closed form: CE = softplus((x1 - x0) * (1 - 2*t)).
        x0 = logits_ref[0, 0].astype(jnp.float32)         # (R, 128)
        x1 = logits_ref[0, 1].astype(jnp.float32)
        sign = 1.0 - 2.0 * tar.astype(jnp.float32)        # +1 if t==0, -1 if t==1
        z = (x1 - x0) * sign
        per_pixel = jnp.maximum(z, 0.0) + jnp.log(1.0 + jnp.exp(-jnp.abs(z)))
    else:
        # Two-pass log-sum-exp over the class planes; each plane is a dense
        # (R, 128) tile so the "class reduction" is plain elementwise VPU work.
        # TODO(synk): for very large C, stream class chunks with lax.fori_loop
        # to bound live f32 intermediates (tile size already shrinks via the
        # VMEM budget, so this is a perf nicety, not a correctness issue).
        m = logits_ref[0, 0].astype(jnp.float32)
        for c in range(1, num_classes):
            m = jnp.maximum(m, logits_ref[0, c].astype(jnp.float32))
        s = jnp.zeros_like(m)
        sel = jnp.zeros_like(m)
        for c in range(num_classes):
            xc = logits_ref[0, c].astype(jnp.float32)
            s = s + jnp.exp(xc - m)
            sel = sel + jnp.where(tar == c, xc, 0.0)
        per_pixel = m + jnp.log(s) - sel

    # Select-based masking (NaN/garbage in invalid pixels cannot propagate).
    loss_sum = jnp.sum(jnp.where(valid, per_pixel, 0.0))
    cnt_sum = jnp.sum(jnp.where(valid, 1.0, 0.0))

    # One lane-dense (1, 1, 128) partial block: loss in lane 0, count in lane 1.
    lane = jax.lax.broadcasted_iota(jnp.int32, (1, 1, _LANES), 2)
    out_ref[...] = jnp.where(lane == 0, loss_sum,
                             jnp.where(lane == 1, cnt_sum, 0.0))


def _choose_tile_rows(num_classes, rows_total, logit_bytes, batch):
    # Per row of 128 pixels (all double-buffered inputs + f32 intermediates):
    #   logits:  C * 128 * logit_bytes   (x2 buffers)
    #   targets: 128 * 4                 (x2 buffers)
    #   interm:  ~4 f32 planes (binary) / ~(2C+4) planes (general, conservative)
    budget = 16 * 1024 * 1024            # conservative: fits v7x's 64 MiB easily
    in_bytes = 2 * _LANES * (num_classes * logit_bytes + 4)
    interm_planes = 4 if num_classes == 2 else 2 * num_classes + 4
    per_row = in_bytes + interm_planes * _LANES * 4
    t = budget // per_row
    t = max(8, (t // 8) * 8)
    t = min(t, 2048)                      # up to 256K pixels / step; overhead amortized
    if batch == 1 and rows_total > 8:
        # Keep >= 2 pixel-tiles so v7x's two TensorCores both get work.
        t = min(t, ((rows_total + 1) // 2 + 7) // 8 * 8)
    if rows_total <= t:
        return rows_total                 # single tile; equals the full dim, always legal
    return t


def cls_loss_with_logits(cls_pred, cls_tar):
    """cls_pred: (N, C, H, W) float logits; cls_tar: (N, H, W) int class ids.

    Matches torch.nn.CrossEntropyLoss() (mean over non-ignored pixels,
    ignore_index=-100 treated as "any negative target").
    """
    n, c, h, w = cls_pred.shape
    hw = h * w

    # Free, contiguous reshapes -- no transpose, no dtype upcast in HBM.
    logits = cls_pred.reshape(n, c, hw)
    targets = cls_tar.reshape(n, 1, hw).astype(jnp.int32)

    hw_pad = ((hw + _LANES - 1) // _LANES) * _LANES
    if hw_pad != hw:
        # TODO(synk): this logits pad materializes an HBM copy; only taken when
        # H*W is not a multiple of 128 (unusual for image-grid outputs).
        logits = jnp.pad(logits, ((0, 0), (0, 0), (0, hw_pad - hw)))
        targets = jnp.pad(targets, ((0, 0), (0, 0), (0, hw_pad - hw)),
                          constant_values=-1)

    rows = hw_pad // _LANES
    logits = logits.reshape(n, c, rows, _LANES)        # free, contiguous
    targets = targets.reshape(n, 1, rows, _LANES)

    logit_bytes = jnp.dtype(logits.dtype).itemsize
    tile_rows = _choose_tile_rows(c, rows, logit_bytes, n)
    num_tiles = pl.cdiv(rows, tile_rows)
    rows_pad = num_tiles * tile_rows
    if rows_pad != rows:
        # Cheap: pad ONLY the int32 targets with -1 to the full grid extent.
        # The last logits block reads out of bounds; `tar >= 0` masks it.
        targets = jnp.pad(targets, ((0, 0), (0, 0), (0, rows_pad - rows), (0, 0)),
                          constant_values=-1)

    kernel = functools.partial(_ce_loss_kernel, num_classes=c)

    flops = n * hw_pad * (6 if c == 2 else 4 * c + 3)
    transcendentals = n * hw_pad * (2 if c == 2 else c + 1)
    bytes_accessed = (n * c * hw_pad * logit_bytes
                      + n * rows_pad * _LANES * 4
                      + n * num_tiles * _LANES * 4)

    parts = pl.pallas_call(
        kernel,
        out_shape=jax.ShapeDtypeStruct((n, num_tiles, _LANES), jnp.float32),
        grid_spec=pltpu.PrefetchScalarGridSpec(
            num_scalar_prefetch=0,
            grid=(n, num_tiles),
            in_specs=[
                pl.BlockSpec((1, c, tile_rows, _LANES), lambda i, t: (i, 0, t, 0)),
                pl.BlockSpec((1, 1, tile_rows, _LANES), lambda i, t: (i, 0, t, 0)),
            ],
            out_specs=pl.BlockSpec((1, 1, _LANES), lambda i, t: (i, t, 0)),
        ),
        compiler_params=pltpu.CompilerParams(
            dimension_semantics=("parallel", "parallel"),
            vmem_limit_bytes=32 * 1024 * 1024,
        ),
        cost_estimate=pl.CostEstimate(
            flops=flops,
            transcendentals=transcendentals,
            bytes_accessed=bytes_accessed,
        ),
    )(logits, targets)

    # Tiny final reduction: loss partials in lane 0, valid-pixel counts in lane 1.
    # (If every pixel is ignored this is 0/0 = NaN, matching PyTorch.)
    return jnp.sum(parts[:, :, 0]) / jnp.sum(parts[:, :, 1])


def _reference_ce(cls_pred, cls_tar):
    # Pure-JAX reference: CrossEntropyLoss(mean, ignore_index = negatives).
    logp = jax.nn.log_softmax(cls_pred.astype(jnp.float32), axis=1)
    tgt = cls_tar.astype(jnp.int32)
    valid = tgt >= 0
    safe = jnp.where(valid, tgt, 0)
    picked = jnp.take_along_axis(logp, safe[:, None, :, :], axis=1)[:, 0]
    picked = jnp.where(valid, picked, 0.0)
    return -jnp.sum(picked) / jnp.sum(valid)


if __name__ == "__main__":
    key = jax.random.PRNGKey(0)
    k1, k2, k3, k4, k5, k6 = jax.random.split(key, 6)

    # Case 1: exactly what the module implies — (minibatch, 2, out_size, out_size).
    N, C, OUT = 2, 2, 16
    cls_pred = jax.random.normal(k1, (N, C, OUT, OUT), dtype=jnp.float32)
    cls_tar = jax.random.randint(k2, (N, OUT, OUT), 0, C, dtype=jnp.int32)
    loss = cls_loss_with_logits(cls_pred, cls_tar)
    jax.block_until_ready(loss)
    ref = _reference_ce(cls_pred, cls_tar)
    assert jnp.allclose(loss, ref, atol=1e-5, rtol=1e-5), (loss, ref)

    # Case 2: general-C path, bf16 logits kept in native dtype, a few
    # ignore_index=-100 pixels.
    N2, C2, OUT2 = 2, 4, 16
    pred2 = jax.random.normal(k3, (N2, C2, OUT2, OUT2), dtype=jnp.bfloat16)
    tar2 = jax.random.randint(k4, (N2, OUT2, OUT2), 0, C2, dtype=jnp.int32)
    tar2 = tar2.at[0, 0, :5].set(-100)
    loss2 = cls_loss_with_logits(pred2, tar2)
    jax.block_until_ready(loss2)
    ref2 = _reference_ce(pred2, tar2)
    assert jnp.allclose(loss2, ref2, atol=1e-5, rtol=1e-5), (loss2, ref2)

    # Case 3: H*W not a multiple of 128 — exercises the (rare) padded path.
    N3, C3, OUT3 = 1, 3, 10
    pred3 = jax.random.normal(k5, (N3, C3, OUT3, OUT3), dtype=jnp.float32)
    tar3 = jax.random.randint(k6, (N3, OUT3, OUT3), 0, C3, dtype=jnp.int32)
    loss3 = cls_loss_with_logits(pred3, tar3)
    jax.block_until_ready(loss3)
    ref3 = _reference_ce(pred3, tar3)
    assert jnp.allclose(loss3, ref3, atol=1e-5, rtol=1e-5), (loss3, ref3)

    print("KERNEL_OK")
</pallas_src>

<mosaic_0001>
module attributes {stable_mosaic.version = 11 : i64} {
  func.func @_ce_loss_kernel(%arg0: i32, %arg1: i32, %arg2: memref<1x2x2x128xf32, #tpu.memory_space<vmem>>, %arg3: memref<1x1x2x128xi32, #tpu.memory_space<vmem>>, %arg4: memref<1x1x128xf32, #tpu.memory_space<vmem>>) attributes {dimension_semantics = [#tpu.dimension_semantics<parallel>, #tpu.dimension_semantics<parallel>], iteration_bounds = array<i64: 2, 1>, scalar_prefetch = 0 : i64, scratch_operands = 0 : i64, tpu.core_type = #tpu.core_type<tc>, window_params = [{transform_indices = @transform_0, window_bounds = array<i64: 1, 2, 2, 128>}, {transform_indices = @transform_1, window_bounds = array<i64: 1, 1, 2, 128>}, {transform_indices = @transform_2, window_bounds = array<i64: 1, 1, 128>}]} {
    %c0 = arith.constant 0 : index
    %c0_0 = arith.constant 0 : index
    %c0_1 = arith.constant 0 : index
    %c0_2 = arith.constant 0 : index
    %0 = vector.load %arg3[%c0, %c0_0, %c0_1, %c0_2] : memref<1x1x2x128xi32, #tpu.memory_space<vmem>>, vector<1x1x2x128xi32>
    %1 = vector.shape_cast %0 : vector<1x1x2x128xi32> to vector<2x128xi32>
    %c0_i32 = arith.constant 0 : i32
    %2 = vector.broadcast %c0_i32 : i32 to vector<2x128xi32>
    %3 = arith.cmpi sge, %1, %2 : vector<2x128xi32>
    %c0_3 = arith.constant 0 : index
    %c0_4 = arith.constant 0 : index
    %c0_5 = arith.constant 0 : index
    %c0_6 = arith.constant 0 : index
    %4 = vector.load %arg2[%c0_3, %c0_4, %c0_5, %c0_6] : memref<1x2x2x128xf32, #tpu.memory_space<vmem>>, vector<1x1x2x128xf32>
    %5 = vector.shape_cast %4 : vector<1x1x2x128xf32> to vector<2x128xf32>
    %c0_7 = arith.constant 0 : index
    %c1 = arith.constant 1 : index
    %c0_8 = arith.constant 0 : index
    %c0_9 = arith.constant 0 : index
    %6 = vector.load %arg2[%c0_7, %c1, %c0_8, %c0_9] : memref<1x2x2x128xf32, #tpu.memory_space<vmem>>, vector<1x1x2x128xf32>
    %7 = vector.shape_cast %6 : vector<1x1x2x128xf32> to vector<2x128xf32>
    %8 = arith.sitofp %1 : vector<2x128xi32> to vector<2x128xf32>
    %cst = arith.constant 2.000000e+00 : f32
    %9 = vector.broadcast %cst : f32 to vector<2x128xf32>
    %10 = arith.mulf %9, %8 : vector<2x128xf32>
    %cst_10 = arith.constant 1.000000e+00 : f32
    %11 = vector.broadcast %cst_10 : f32 to vector<2x128xf32>
    %12 = arith.subf %11, %10 : vector<2x128xf32>
    %13 = arith.subf %7, %5 : vector<2x128xf32>
    %14 = arith.mulf %13, %12 : vector<2x128xf32>
    %cst_11 = arith.constant 0.000000e+00 : f32
    %15 = vector.broadcast %cst_11 : f32 to vector<2x128xf32>
    %16 = arith.maximumf %14, %15 : vector<2x128xf32>
    %17 = math.absf %14 : vector<2x128xf32>
    %cst_12 = arith.constant 0.000000e+00 : f32
    %18 = vector.broadcast %cst_12 : f32 to vector<2x128xf32>
    %19 = arith.subf %18, %17 : vector<2x128xf32>
    %20 = math.exp %19 : vector<2x128xf32>
    %cst_13 = arith.constant 1.000000e+00 : f32
    %21 = vector.broadcast %cst_13 : f32 to vector<2x128xf32>
    %22 = arith.addf %21, %20 : vector<2x128xf32>
    %23 = math.log %22 : vector<2x128xf32>
    %24 = arith.addf %16, %23 : vector<2x128xf32>
    %cst_14 = arith.constant 0.000000e+00 : f32
    %25 = vector.broadcast %cst_14 : f32 to vector<2x128xf32>
    %26 = arith.select %3, %24, %25 : vector<2x128xi1>, vector<2x128xf32>
    %27 = vector.shape_cast %26 : vector<2x128xf32> to vector<1x2x128xf32>
    %cst_15 = arith.constant dense<0.000000e+00> : vector<1xf32>
    %28 = vector.multi_reduction <add>, %27, %cst_15 [1, 2] : vector<1x2x128xf32> to vector<1xf32>
    %29 = vector.shape_cast %28 : vector<1xf32> to vector<1x1x1xf32>
    %30 = vector.extract %29[0, 0, 0] : f32 from vector<1x1x1xf32>
    %cst_16 = arith.constant 1.000000e+00 : f32
    %cst_17 = arith.constant 0.000000e+00 : f32
    %31 = vector.broadcast %cst_16 : f32 to vector<2x128xf32>
    %32 = vector.broadcast %cst_17 : f32 to vector<2x128xf32>
    %33 = arith.select %3, %31, %32 : vector<2x128xi1>, vector<2x128xf32>
    %34 = vector.shape_cast %33 : vector<2x128xf32> to vector<1x2x128xf32>
    %cst_18 = arith.constant dense<0.000000e+00> : vector<1xf32>
    %35 = vector.multi_reduction <add>, %34, %cst_18 [1, 2] : vector<1x2x128xf32> to vector<1xf32>
    %36 = vector.shape_cast %35 : vector<1xf32> to vector<1x1x1xf32>
    %37 = vector.extract %36[0, 0, 0] : f32 from vector<1x1x1xf32>
    %38 = tpu.iota {dimensions = array<i32: 2>} : vector<1x1x128xi32>
    %c0_i32_19 = arith.constant 0 : i32
    %39 = vector.broadcast %c0_i32_19 : i32 to vector<1x1x128xi32>
    %40 = arith.cmpi eq, %38, %39 : vector<1x1x128xi32>
    %c1_i32 = arith.constant 1 : i32
    %41 = vector.broadcast %c1_i32 : i32 to vector<1x1x128xi32>
    %42 = arith.cmpi eq, %38, %41 : vector<1x1x128xi32>
    %cst_20 = arith.constant 0.000000e+00 : f32
    %43 = vector.broadcast %37 : f32 to vector<1x1x128xf32>
    %44 = vector.broadcast %cst_20 : f32 to vector<1x1x128xf32>
    %45 = arith.select %42, %43, %44 : vector<1x1x128xi1>, vector<1x1x128xf32>
    %46 = vector.broadcast %30 : f32 to vector<1x1x128xf32>
    %47 = arith.select %40, %46, %45 : vector<1x1x128xi1>, vector<1x1x128xf32>
    %c0_21 = arith.constant 0 : index
    %c0_22 = arith.constant 0 : index
    %c0_23 = arith.constant 0 : index
    %48 = vector.load %arg4[%c0_21, %c0_22, %c0_23] : memref<1x1x128xf32, #tpu.memory_space<vmem>>, vector<1x1x128xf32>
    tpu.vector_store %arg4[%c0_21, %c0_22, %c0_23], %47 {strides = array<i32>} : memref<1x1x128xf32, #tpu.memory_space<vmem>>, vector<1x1x128xf32>,
    return
  }
  func.func @transform_0(%arg0: i32, %arg1: i32) -> (i32, i32, i32, i32) {
    %c0_i32 = arith.constant 0 : i32
    %c0_i32_0 = arith.constant 0 : i32
    %c0_i32_1 = arith.constant 0 : i32
    return %arg0, %c0_i32, %arg1, %c0_i32_0 : i32, i32, i32, i32
  }
  func.func @transform_1(%arg0: i32, %arg1: i32) -> (i32, i32, i32, i32) {
    %c0_i32 = arith.constant 0 : i32
    %c0_i32_0 = arith.constant 0 : i32
    %c0_i32_1 = arith.constant 0 : i32
    return %arg0, %c0_i32, %arg1, %c0_i32_0 : i32, i32, i32, i32
  }
  func.func @transform_2(%arg0: i32, %arg1: i32) -> (i32, i32, i32) {
    %c0_i32 = arith.constant 0 : i32
    %c0_i32_0 = arith.constant 0 : i32
    return %arg0, %arg1, %c0_i32 : i32, i32, i32
  }
}

</mosaic_0001>

<bundles_post_ra>
// kernel: tpu_custom_call.1
= control target key start
LH: loop header
LB: loop body
LE: loop exit
PB: predicated region body
PF: predicated region fallthrough
CT: control target
= control target key end

     0   :  { %7 = vsyncpa [#allocation3], 0  ;;  %s811_s0 = inlined_call_operand.hbm [shape: f32[2,2,2,128], index: 0, kind: input, shape index: {}]   ;;  %s812_s1 = inlined_call_operand.hbm [shape: s32[2,1,2,128], index: 1, kind: input, shape index: {}]   ;;  %s813_s2 = inlined_call_operand.hbm [shape: f32[2,1,128], index: 2, kind: output, shape index: {}]  }
   0x1   :  { %9 = vsyncpa [#allocation3 + $0x1], 0 }
   0x2   :  { %10 = vsyncpa [#allocation6], 0 }
   0x3   :  { %12 = vsyncpa [#allocation6 + $0x1], 0 }
   0x4   :  { %13 = vsyncpa [#allocation4], 0 }
   0x5   :  { %15 = vsyncpa [#allocation4 + $0x1], 0  ;;  %s642_s9 = smov 0   ;;  %s644_s10 = smov 0  }
   0x6   :  { %s646_s11 = smov 0   ;;  %s648_s12 = smov 0  }
   0x7   :  { %s650_s13 = smov 0   ;;  %s652_s14 = smov 0  }
   0x8 LB: > { %s384_s15 = sadd.s32 4294967295, %s619_s14   ;;  %s385_s16 = sadd.s32 4294967294, %s619_s14   ;;  %s619_s14 = sphi %s652_s14, %s21_s14   ;;  %s615_s13 = sphi %s650_s13, %s824_s13   ;;  %s611_s12 = sphi %s648_s12, %s823_s12   ;;  %s607_s11 = sphi %s646_s11, %s822_s11   ;;  %s603_s10 = sphi %s644_s10, %s821_s10   ;;  %s599_s9 = sphi %s642_s9, %s820_s9  }
   0x9   : > { %s33_s17 = sadd.s32 1, %s615_s13  ;;  %s42_s18 = sadd.s32 1, %s607_s11 }
   0xa   : > { %p35_p0 = scmp.ge.s32.totalorder %s33_s17, 2  ;;  %p49_p1 = scmp.ne.s32.totalorder %s607_s11, %s603_s10 }
   0xb   : > { %p50_p2 = scmp.eq.s32.totalorder %s619_s14, 0  ;;  %p55_p3 = scmp.ne.s32.totalorder %s603_s10, %s599_s9 }
   0xc   : > { %s826_s17 = smov (%p35_p0, %s33_s17), 0  ;;  %p56_p5 = scmp.eq.s32.totalorder %s384_s15, 0 }
   0xd   : > { %p683_p4 = por %p50_p2, %p49_p1  ;;  %s37_s20 = ssub.s32 %s615_s13, %s826_s17 }
   0xe   : > { %p109_p6 = scmp.eq.s32.totalorder %s384_s15, 1  ;;  %p40_p7 = scmp.eq.s32.totalorder %s37_s20, 0 }
   0xf   : > { %p689_p8 = por %p56_p5, %p55_p3  ;;  %p115_p10 = scmp.eq.s32.totalorder %s385_s16, 1 }
  0x10   : > { %p693_p9 = por %p109_p6, %p49_p1  ;;  %p387_p12 = scmp.ge.s32.totalorder %s619_s14, 2 }
  0x11   : > { %s698_s23 = scalar_select %p40_p7, %s607_s11, %s42_s18  }
  0x12   : > { %p700_p11 = por %p115_p10, %p55_p3  ;;  %p422_p13 = scmp.lt.s32.totalorder %s619_s14, 2 }
  0x13   : > { %s707_s25 = sand.u32 1, %s607_s11   ;;  %s400_s27 = sshll.u32 %s615_s13, 6 }
  0x14   : > { %s388_s26 = sshll.u32 %s707_s25, 2  ;;  %s146_s30 = scalar_lea.hbm %s811_s0, %s400_s27 }
  0x15   : > { %s139_s3 = scalar_lea.vmem [#allocation2], %s388_s26  ;;  %p716_p0 = pnand %p422_p13, %p683_p4 }
  0x16   : > { %s147_s4 = sshll.u32 %s139_s3, 4  ;;  %p393_p1 = scmp.ge.s32.totalorder %s619_s14, 1  ;;  %s148_s4 = int_to_ptr.vmem [resolvable:$true] %s147_s4 }
  0x17   : > { %s136_s6 = scalar_lea.sflag [#allocation3], %s707_s25  ;;  %p481_p2 = pneg %p716_p0 }
  0x18   : > { %s492_s7 = scalar_lea.vmem %s148_s4, 64  ;;  %s621_s8 = smov [#allocation2]  }
  0x19   : > { %p493_p3 = scmp.ne.s32.totalorder %s148_s4, %s492_s7  ;;  %s497_s15 = sshll.u32 %s621_s8, 4  ;;  %s498_s15 = int_to_ptr.vmem [resolvable:$false] %s497_s15 }
  0x1a   : > { %s499_s16 = scalar_lea.vmem %s498_s15, 128  ;;  %p500_p4 = scmp.lt.s32.totalorder %s148_s4, %s498_s15 }
  0x1b   : > { %p495_p5 = pnand %p493_p3, %p481_p2  ;;  %p501_p7 = scmp.lt.s32.totalorder %s499_s16, %s492_s7 }
  0x1d   : > { %p496_p6 = pneg %p495_p5  ;;  %p502_p10 = por %p501_p7, %p500_p4 }
  0x1f   : > { %p503_p13 = pnand %p502_p10, %p496_p6 }
  0x21   : > { %506 = shalt.err (!%p503_p13)
}
  0x22   : > { %s622_s18 = smov 32   ;;  %s623_s19 = smov 2  }
  0x23   : > { %414 = dma.hbm_to_vmem [thread:$0]  (!%p716_p0), %s146_s30, 64, %s148_s4, %s136_s6, %s622_s18, %s622_s18, %s623_s19  }
  0x24   : > { %p174_p3 = scmp.lt.s32.totalorder %s619_s14, 3  ;;  %s391_s20 = sshll.u32 %s707_s25, 1 }
  0x25   : > { %s392_s26 = sshll.u32 %s615_s13, 5  ;;  %s161_s7 = scalar_lea.vmem [#allocation5], %s391_s20 }
  0x26   : > { %p734_p5 = pnand %p393_p1, %p174_p3  ;;  %s167_s3 = scalar_lea.hbm %s812_s1, %s392_s26 }
  0x27   : > { %s169_s8 = sshll.u32 %s161_s7, 4  ;;  %s158_s15 = scalar_lea.sflag [#allocation6], %s707_s25  ;;  %s170_s8 = int_to_ptr.vmem [resolvable:$true] %s169_s8 }
  0x28   : > { %s520_s16 = scalar_lea.vmem %s170_s8, 32  ;;  %s624_s30 = smov [#allocation5]  }
  0x29   : > { %p521_p6 = scmp.ne.s32.totalorder %s170_s8, %s520_s16  ;;  %s525_s4 = sshll.u32 %s624_s30, 4  ;;  %s526_s4 = int_to_ptr.vmem [resolvable:$false] %s525_s4 }
  0x2a   : > { %s527_s6 = scalar_lea.vmem %s526_s4, 64  ;;  %p528_p1 = scmp.lt.s32.totalorder %s170_s8, %s526_s4 }
  0x2b   : > { %p523_p4 = pnand %p521_p6, %p481_p2  ;;  %p529_p10 = scmp.lt.s32.totalorder %s527_s6, %s520_s16 }
  0x2d   : > { %p524_p7 = pneg %p523_p4  ;;  %p530_p13 = por %p529_p10, %p528_p1 }
  0x2f   : > { %p531_p3 = pnand %p530_p13, %p524_p7 }
  0x31   : > { %534 = shalt.err (!%p531_p3)
}
  0x32   : > { %417 = dma.hbm_to_vmem [thread:$0]  (!%p716_p0), %s167_s3, 32, %s170_s8, %s158_s15  }
  0x33   : > { %178 = sbr.rel (%p734_p5) target bundleno = 331 (0x14b), region = 28  ;;  %s750_s25 = sand.u32 (!%p734_p5), 1, %s603_s10  }
  0x34   : > { %s394_s18 = sshll.u32 (!%p734_p5), %s750_s25, 2  ;;  %s181_s19 = scalar_lea.sflag (!%p734_p5), [#allocation3], %s750_s25 }
  0x35   : > { %s184_s20 = scalar_lea.vmem (!%p734_p5), [#allocation2], %s394_s18 }
  0x38   : > { %586 = dma.done.wait (%p689_p8), %s181_s19, 64  }
  0x39   : > { %588 = vsyncadd (%p689_p8), %s181_s19, 4294967232  ;;  %s395_s5 = sshll.u32 %s750_s25, 1  ;;  %s190_s26 = scalar_lea.sflag [#allocation6], %s750_s25 }
  0x3a   : > { %s193_s27 = scalar_lea.vmem [#allocation5], %s395_s5 }
  0x3b   : > { %590 = dma.done.wait (%p689_p8), %s190_s26, 32  }
  0x3c   : > { %592 = vsyncadd (%p689_p8), %s190_s26, 4294967264  ;;  %v218_v0 = vld [vmem:[%s193_s27] sm:$0x3]  ;;  %v220_v1 = vld [vmem:[%s184_s20] sm:$0x3]  ;;  %vm238_vm1 = vcmask 1041408   ;;  %v260_v36 = vlaneseq }
  0x3d   : > { %v396_v2 = vld [vmem:[%s184_s20 + $0x2] sm:$0x3]  ;;  %v223_v3 = vcvt.s32.f32 %v218_v0  ;;  %vm219_vm0 = vcmp.ge.s32.totalorder %v218_v0, 0  ;;  %v625_v18 = vmov 0.0   ;;  %s397_s21 = sshll.u32 %s611_s12, 4  ;;  %s217_s29 = scalar_lea.vmem [#allocation7], %s750_s25 }
  0x3e   : > { %v226_v5 = vsub.f32 %v396_v2, %v220_v1  ;;  %v249_v19 = vsel %vm219_vm0, 1.0, %v625_v18  ;;  %v261_v37 = vand.u32 127, %v260_v36  ;;  %s283_s3 = sshll.u32 %s217_s29, 4  ;;  %s769_s16 = scalar_lea.hbm %s813_s2, %s397_s21  ;;  %s284_s3 = int_to_ptr.vmem [resolvable:$true] %s283_s3 }
  0x3f   : > { %v224_v4 = vmul.f32 2.0, %v223_v3  ;;  %v250_v21 = vsel %vm238_vm1, %v249_v19, 0.0  ;;  %s270_s30 = scalar_lea.sflag [#allocation4], %s750_s25  ;;  %s535_s12 = scalar_lea.vmem %s284_s3, 16 }
  0x40   : > { %vm263_vm2 = vcmp.eq.s32.totalorder %v261_v37, 1  ;;  %vm262_vm3 = vcmp.eq.s32.totalorder %v261_v37, 0  ;;  %p536_p8 = scmp.ne.s32.totalorder %s284_s3, %s535_s12  ;;  %s626_s4 = smov [#allocation7]  }
  0x41   : > { %v225_v6 = vsub.f32 1.0, %v224_v4  ;;  %s539_s6 = sshll.u32 %s626_s4, 4  ;;  %s540_s6 = int_to_ptr.vmem [resolvable:$false] %s539_s6 }
  0x42   : > { %p537_p0 = pnand %p536_p8, %p693_p9  ;;  %s541_s18 = scalar_lea.vmem %s540_s6, 32 }
  0x43   : > { %v227_v7 = vmul.f32 %v226_v5, %v225_v6  ;;  %p542_p5 = scmp.lt.s32.totalorder %s284_s3, %s540_s6  ;;  %p543_p6 = scmp.lt.s32.totalorder %s541_s18, %s535_s12 }
  0x44   : > { %p538_p2 = pneg %p537_p0 }
  0x45   : > { %v229_v8 = vand.u32 2147483647, %v227_v7  ;;  %v228_v13 = vmax.f32 %v227_v7, 0.0  ;;  %p544_p4 = por %p543_p6, %p542_p5 }
  0x47   : > { %v230_v9 = vsub.f32 0.0, %v229_v8  ;;  %p545_p7 = pnand %p544_p4, %p538_p2 }
  0x49   : > { %v231_v10 = vmul.f32 1.442695, %v230_v9 }
  0x4b   : > { %475 = vpow2.f32 %v231_v10 }
  0x58   : > { %v476_v11 = vpop.eup %475 }
  0x59   : > { %v233_v12 = vadd.f32 1.0, %v476_v11 }
  0x5b   : > { %477 = vlog2.f32 %v233_v12 }
  0x68   : > { %v478_v14 = vpop.eup %477 }
  0x69   : > { %v235_v15 = vmul.f32 0.6931472, %v478_v14 }
  0x6b   : > { %v236_v16 = vadd.f32 %v235_v15, %v228_v13 }
  0x6d   : > { %v237_v17 = vsel %vm219_vm0, %v236_v16, 0.0 }
  0x6e   : > { %v239_v20 = vsel %vm238_vm1, %v237_v17, 0.0 }
  0x6f   : > { %240 = vadd.xlane.f32.xlu0 %v239_v20 }
  0x73   : > { %251 = vadd.xlane.f32.xlu0 %v250_v21 }
  0xf8   : > { %v241_v22 = vpop.xlane.xlu0 %240 }
  0xf9   : > { %v242_v23 = vrot.slane %v241_v22, 4 }
  0xfb   : > { %v243_v24 = vadd.f32 %v242_v23, %v241_v22 }
  0xfc   : > { %v252_v25 = vpop.xlane.xlu0 %251 }
  0xfd   : > { %v244_v26 = vrot.slane %v243_v24, 2  ;;  %v253_v27 = vrot.slane %v252_v25, 4 }
  0xff   : > { %v254_v28 = vadd.f32 %v253_v27, %v252_v25  ;;  %v245_v29 = vadd.f32 %v244_v26, %v243_v24 }
 0x101   : > { %v255_v30 = vrot.slane %v254_v28, 2  ;;  %v246_v31 = vrot.slane %v245_v29, 1 }
 0x103   : > { %v256_v32 = vadd.f32 %v255_v30, %v254_v28  ;;  %v247_v33 = vadd.f32 %v246_v31, %v245_v29 }
 0x105   : > { %401 = vpush %v247_v33  ;;  %v257_v34 = vrot.slane %v256_v32, 1 }
 0x107   : > { %v258_v35 = vadd.f32 %v257_v34, %v256_v32 }
 0x109   : > { %403 = vpush %v258_v35 }
 0x136   : > { %s402_s28 = spop %401 }
 0x137   : > { %v266_v39 = vstv %s402_s28 }
 0x13a   : > { %s404_s7 = spop %403 }
 0x13b   : > { %v264_v38 = vstv %s404_s7 }
 0x13c   : > { %v265_v40 = vsel %vm263_vm2, %v264_v38, 0.0 }
 0x13d   : > { %v267_v41 = vsel %vm262_vm3, %v266_v39, %v265_v40 }
 0x13e   : > { %268 = vst [vmem:[%s217_s29] sm:$0x1] %v267_v41 }
 0x13f   : > { %548 = shalt.err (!%p545_p7)
}
 0x140   : > { %s549_s19 = scalar_lea.hbm %s769_s16, 16  ;;  %s553_s5 = scalar_lea.hbm %s813_s2, 32 }
 0x141   : > { %p550_p1 = scmp.ne.s32.totalorder %s769_s16, %s549_s19  ;;  %p554_p3 = scmp.lt.s32.totalorder %s769_s16, %s813_s2 }
 0x142   : > { %p555_p8 = scmp.lt.s32.totalorder %s553_s5, %s549_s19 }
 0x143   : > { %p551_p10 = pnand %p550_p1, %p693_p9 }
 0x144   : > { %p556_p0 = por %p555_p8, %p554_p3 }
 0x145   : > { %p552_p13 = pneg %p551_p10 }
 0x147   : > { %p557_p2 = pnand %p556_p0, %p552_p13 }
 0x149   : > { %560 = shalt.err (!%p557_p2)
}
 0x14a   : > { %409 = dma.vmem_to_hbm [thread:$0]  (%p693_p9), %s284_s3, 16, %s769_s16, %s270_s30  }
 0x14b PF: > { %s295_s21 = sand.u32 1, %s599_s9   ;;  %p419_p5 = pnand %p387_p12, %p700_p11 }
 0x14c   : > { %s296_s28 = scalar_lea.sflag [#allocation4], %s295_s21 }
 0x14d   : > { %p420_p6 = pneg %p419_p5 }
 0x14f   : > { %594 = dma.done.wait (%p420_p6), %s296_s28, 16  }
 0x150   : > { %596 = vsyncadd (%p420_p6), %s296_s28, 4294967280  ;;  %s21_s14 = sadd.s32 1, %s619_s14   ;;  %s820_s9 = smov %s603_s10 }
 0x151   : > { %p18_p4 = scmp.ge.s32.totalorder %s21_s14, 4   ;;  %s821_s10 = smov %s607_s11 }
 0x152   : > { %s822_s11 = smov %s698_s23  ;;  %s823_s12 = smov %s615_s13 }
 0x153   : > { %s824_s13 = smov %s826_s17  ;;  %20 = sbr.rel (!%p18_p4) target bundleno = 8 (0x8), region = 87 }
 0x158   :  { %300 = vsyncpa [#allocation3], 1 }
 0x159   :  { %302 = vsyncpa [#allocation3 + $0x1], 1 }
 0x15a   :  { %303 = vsyncpa [#allocation6], 1 }
 0x15b   :  { %305 = vsyncpa [#allocation6 + $0x1], 1 }
 0x15c   :  { %306 = vsyncpa [#allocation4], 1 }
 0x15d   :  { %308 = vsyncpa [#allocation4 + $0x1], 1 }

</bundles_post_ra>
